<compile_context>
chip_gen: v6e
topology: v6e:2x2x1
jax: 0.10.0
libtpu: 0.0.40
codegen_flags: <defaults>
</compile_context>

<pallas_src>
import jax
import jax.numpy as jnp
from jax.experimental import pallas as pl
from jax.experimental.pallas import tpu as pltpu


def _round_up(x, m):
    return ((x + m - 1) // m) * m


def _balanced_tile(total, max_tile, align):
    """Split `total` into the fewest tiles of size <= max_tile, balanced,
    rounded up to `align` (minimizes pad waste vs. min(max_tile, total))."""
    n_tiles = -(-total // max_tile)
    return _round_up(-(-total // n_tiles), align)


# ---------------------------------------------------------------------------
# Kernels. Grid = (batch_tiles, vocab_tiles); vocab axis is innermost.
# h = relu(x @ w1 + b1) is computed once per batch tile (vocab step 0) into a
# VMEM scratch and reused for every vocab tile of that batch tile.
# ---------------------------------------------------------------------------

def _second_linear(h_ref, w2_ref, b2_ref, o_ref):
    logits = jnp.dot(h_ref[...].astype(w2_ref.dtype), w2_ref[...],
                     preferred_element_type=jnp.float32)
    o_ref[...] = (logits + b2_ref[...]).astype(o_ref.dtype)


def _head_kernel_concat(x_ref, w1_ref, b1_ref, w2_ref, b2_ref, o_ref, h_ref):
    # Small-D path: x is the pre-concatenated [TM, 2D] tile -> one K=2D dot.
    @pl.when(pl.program_id(1) == 0)
    def _():
        h = jnp.dot(x_ref[...], w1_ref[...], preferred_element_type=jnp.float32)
        h_ref[...] = jnp.maximum(h + b1_ref[...], 0.0)

    _second_linear(h_ref, w2_ref, b2_ref, o_ref)


def _head_kernel_split(ue_ref, ie_ref, w1u_ref, w1i_ref, b1_ref,
                       w2_ref, b2_ref, o_ref, h_ref):
    # Large-D path: the concat is fused away as a split matmul, so no
    # [B, 2D] intermediate is ever materialized in HBM.
    @pl.when(pl.program_id(1) == 0)
    def _():
        h = jnp.dot(ue_ref[...], w1u_ref[...], preferred_element_type=jnp.float32)
        h = h + jnp.dot(ie_ref[...], w1i_ref[...],
                        preferred_element_type=jnp.float32)
        h_ref[...] = jnp.maximum(h + b1_ref[...], 0.0)

    _second_linear(h_ref, w2_ref, b2_ref, o_ref)


def _const_spec(block_shape, single_buffer):
    """Constant-index (resident) weight spec; single-buffered when possible."""
    if single_buffer:
        return pl.BlockSpec(block_shape, lambda i, j: (0, 0),
                            pipeline_mode=pl.Buffered(1))
    return pl.BlockSpec(block_shape, lambda i, j: (0, 0))


def generation_head(user_emb, item_emb, w1, b1, w2, b2, *, vocab_size,
                    tile_m=256, tile_n=512):
    """Fused (concat -> Linear -> ReLU -> Linear) head. Returns [B, V] f32."""
    B, D = user_emb.shape
    H = w1.shape[1]
    Vp = w2.shape[1]                      # already padded to 128 lanes
    isz = jnp.dtype(w2.dtype).itemsize

    # ---- tile selection -------------------------------------------------
    TM = _balanced_tile(B, tile_m, 8)
    Bp = _round_up(B, TM)
    TN = _balanced_tile(Vp, tile_n, 128)
    Vq = _round_up(Vp, TN)
    if Vq != Vp:
        w2 = jnp.pad(w2, ((0, 0), (0, Vq - Vp)))
        b2 = jnp.pad(b2, ((0, 0), (0, Vq - Vp)))
    pad_b = Bp - B

    grid = (Bp // TM, Vq // TN)

    # ---- choose concat-fused (small D) vs split-matmul (large D) --------
    use_concat = D < 128
    if use_concat:
        x = jnp.concatenate([user_emb, item_emb], axis=-1)   # tiny for small D
        if pad_b:
            x = jnp.pad(x, ((0, pad_b), (0, 0)))
        inputs = (x, w1, b1, w2, b2)
        kernel = _head_kernel_concat
    else:
        ue, ie = user_emb, item_emb
        if pad_b:
            ue = jnp.pad(ue, ((0, pad_b), (0, 0)))
            ie = jnp.pad(ie, ((0, pad_b), (0, 0)))
        inputs = (ue, ie, w1[:D], w1[D:], b1, w2, b2)
        kernel = _head_kernel_split

    # ---- VMEM budget / advisory cost -------------------------------------
    vmem_bytes = (
        2 * TM * 2 * D * isz              # activation tile(s), double-buffered
        + (2 * D * H + H) * isz           # w1 + b1 (target: single-buffered)
        + 2 * (H * TN + TN) * isz         # w2 + b2 tiles, double-buffered
        + 2 * TM * TN * 4                 # output tile, double-buffered
        + TM * H * 4                      # h scratch
    )
    vmem_limit = int(min(64 * 1024 * 1024,
                         max(2 * vmem_bytes, 16 * 1024 * 1024)))
    flops = 2 * Bp * (2 * D * H + H * Vq)
    bytes_accessed = isz * (Bp * 2 * D + 2 * D * H + H + H * Vq + Vq) + 4 * Bp * Vq

    def _build(single_buffer):
        if use_concat:
            in_specs = [
                pl.BlockSpec((TM, 2 * D), lambda i, j: (i, 0)),   # x tile
                _const_spec((2 * D, H), single_buffer),           # w1
                _const_spec((1, H), single_buffer),               # b1
                pl.BlockSpec((H, TN), lambda i, j: (0, j)),       # w2 tile
                pl.BlockSpec((1, TN), lambda i, j: (0, j)),       # b2 tile
            ]
        else:
            in_specs = [
                pl.BlockSpec((TM, D), lambda i, j: (i, 0)),       # user tile
                pl.BlockSpec((TM, D), lambda i, j: (i, 0)),       # item tile
                _const_spec((D, H), single_buffer),               # w1[:D]
                _const_spec((D, H), single_buffer),               # w1[D:]
                _const_spec((1, H), single_buffer),               # b1
                pl.BlockSpec((H, TN), lambda i, j: (0, j)),       # w2 tile
                pl.BlockSpec((1, TN), lambda i, j: (0, j)),       # b2 tile
            ]
        return pl.pallas_call(
            kernel,
            out_shape=jax.ShapeDtypeStruct((Bp, Vq), jnp.float32),
            grid_spec=pltpu.PrefetchScalarGridSpec(
                num_scalar_prefetch=0,
                grid=grid,
                in_specs=in_specs,
                out_specs=pl.BlockSpec((TM, TN), lambda i, j: (i, j)),
                scratch_shapes=[pltpu.VMEM((TM, H), jnp.float32)],
            ),
            compiler_params=pltpu.CompilerParams(
                dimension_semantics=("parallel", "arbitrary"),
                vmem_limit_bytes=vmem_limit),
            cost_estimate=pl.CostEstimate(flops=flops, transcendentals=0,
                                          bytes_accessed=bytes_accessed),
        )

    # Prefer single-buffered resident weights (halves their VMEM footprint);
    # fall back to default double-buffering if this JAX rejects Buffered(1).
    out = None
    last_err = None
    for single_buffer in (True, False):
        try:
            out = _build(single_buffer)(*inputs)
            break
        except Exception as e:  # noqa: BLE001 - fallback path
            last_err = e
    if out is None:
        raise last_err

    return out[:B, :vocab_size]


class SimpleGenerationPallas:
    """JAX/Pallas port of SimpleGeneration (deterministic synthetic params)."""

    def __init__(self, embedding_dim, vocab_size=1000, key=None,
                 dtype=jnp.float32):
        if key is None:
            key = jax.random.PRNGKey(0)
        D, V = embedding_dim, vocab_size
        Vp = _round_up(V, 128)          # lane-dense logits: pad vocab to 128
        self.embedding_dim = D
        self.vocab_size = V
        self.dtype = dtype              # bf16 on v6e/v7x halves w2 HBM bytes
        k1, k2, k3, k4 = jax.random.split(key, 4)
        scale = 0.1
        self.w1 = (scale * jax.random.normal(k1, (2 * D, D),
                                             jnp.float32)).astype(dtype)
        self.b1 = scale * jax.random.normal(k2, (1, D), jnp.float32)
        w2 = scale * jax.random.normal(k3, (D, V), jnp.float32)
        b2 = scale * jax.random.normal(k4, (1, V), jnp.float32)
        self.w2 = jnp.pad(w2, ((0, 0), (0, Vp - V))).astype(dtype)
        self.b2 = jnp.pad(b2, ((0, 0), (0, Vp - V)))

    def __call__(self, user_emb, item_emb):
        ue = user_emb.astype(self.dtype)
        ie = item_emb.astype(self.dtype)
        return generation_head(ue, ie, self.w1, self.b1, self.w2, self.b2,
                               vocab_size=self.vocab_size)


def _reference(model, user_emb, item_emb):
    """Pure-JAX reference matching the PyTorch forward (mirrors kernel casts)."""
    x = jnp.concatenate([user_emb.astype(model.dtype),
                         item_emb.astype(model.dtype)], axis=-1)
    h = jnp.dot(x, model.w1, preferred_element_type=jnp.float32) + model.b1
    h = jnp.maximum(h, 0.0)
    logits = jnp.dot(h.astype(model.dtype), model.w2,
                     preferred_element_type=jnp.float32) + model.b2
    return logits[:, :model.vocab_size]


if __name__ == "__main__":
    # Case 1: PyTorch defaults (D=32, vocab=1000). Small-D concat path,
    # vocab padded 1000 -> 1024 lanes, two 512-lane vocab tiles.
    D, V, B = 32, 1000, 8
    model = SimpleGenerationPallas(D, V, key=jax.random.PRNGKey(0))
    ku, ki = jax.random.split(jax.random.PRNGKey(0))
    user_emb = jax.random.normal(ku, (B, D), jnp.float32)
    item_emb = jax.random.normal(ki, (B, D), jnp.float32)

    logits = model(user_emb, item_emb)
    jax.block_until_ready(logits)
    ref = _reference(model, user_emb, item_emb)
    assert logits.shape == (B, V), logits.shape
    err = float(jnp.max(jnp.abs(logits - ref)))
    # Tolerance covers MXU default-precision (bf16 multi-pass) differences.
    assert jnp.allclose(logits, ref, atol=2e-2, rtol=2e-2), err

    # Case 2: D=128 -> split-matmul path (concat fused away, no [B, 2D] in
    # HBM), bf16 weights/activations with f32 accumulation, odd batch.
    D2, V2, B2 = 128, 1000, 24
    model2 = SimpleGenerationPallas(D2, V2, key=jax.random.PRNGKey(1),
                                    dtype=jnp.bfloat16)
    ku2, ki2 = jax.random.split(jax.random.PRNGKey(2))
    user_emb2 = jax.random.normal(ku2, (B2, D2), jnp.float32)
    item_emb2 = jax.random.normal(ki2, (B2, D2), jnp.float32)

    logits2 = model2(user_emb2, item_emb2)
    jax.block_until_ready(logits2)
    ref2 = _reference(model2, user_emb2, item_emb2)
    assert logits2.shape == (B2, V2), logits2.shape
    err2 = float(jnp.max(jnp.abs(logits2 - ref2)))
    assert jnp.allclose(logits2, ref2, atol=5e-2, rtol=5e-2), err2

    print("KERNEL_OK")
</pallas_src>

<mosaic_0001>
module attributes {stable_mosaic.version = 11 : i64} {
  func.func @_head_kernel_concat(%arg0: i32, %arg1: i32, %arg2: memref<8x64xf32, #tpu.memory_space<vmem>>, %arg3: memref<64x32xf32, #tpu.memory_space<vmem>>, %arg4: memref<1x32xf32, #tpu.memory_space<vmem>>, %arg5: memref<32x512xf32, #tpu.memory_space<vmem>>, %arg6: memref<1x512xf32, #tpu.memory_space<vmem>>, %arg7: memref<8x512xf32, #tpu.memory_space<vmem>>, %arg8: memref<8x32xf32, #tpu.memory_space<vmem>>) attributes {dimension_semantics = [#tpu.dimension_semantics<parallel>, #tpu.dimension_semantics<arbitrary>], iteration_bounds = array<i64: 1, 2>, scalar_prefetch = 0 : i64, scratch_operands = 1 : i64, tpu.core_type = #tpu.core_type<tc>, window_params = [{transform_indices = @transform_0, window_bounds = array<i64: 8, 64>}, {pipeline_mode = #tpu.pipeline_mode<synchronous>, transform_indices = @transform_1, window_bounds = array<i64: 64, 32>}, {pipeline_mode = #tpu.pipeline_mode<synchronous>, transform_indices = @transform_2, window_bounds = array<i64: 1, 32>}, {transform_indices = @transform_3, window_bounds = array<i64: 32, 512>}, {transform_indices = @transform_4, window_bounds = array<i64: 1, 512>}, {transform_indices = @transform_5, window_bounds = array<i64: 8, 512>}]} {
    %c0_i32 = arith.constant 0 : i32
    %0 = arith.cmpi eq, %arg1, %c0_i32 : i32
    %1 = arith.extui %0 : i1 to i32
    %c0_i32_0 = arith.constant 0 : i32
    %2 = arith.cmpi ne, %1, %c0_i32_0 : i32
    scf.if %2 {
      %c0_8 = arith.constant 0 : index
      %c0_9 = arith.constant 0 : index
      %10 = vector.load %arg2[%c0_8, %c0_9] : memref<8x64xf32, #tpu.memory_space<vmem>>, vector<8x64xf32>
      %c0_10 = arith.constant 0 : index
      %c0_11 = arith.constant 0 : index
      %11 = vector.load %arg3[%c0_10, %c0_11] : memref<64x32xf32, #tpu.memory_space<vmem>>, vector<64x32xf32>
      %cst_12 = arith.constant dense<0.000000e+00> : vector<8x32xf32>
      %12 = tpu.matmul %10, %11, %cst_12 {dimension_numbers = #tpu.dot_dimension_numbers<[1], [0], [0], [1], [0, 0, 1, 1], [], []>} : vector<8x64xf32>, vector<64x32xf32>, vector<8x32xf32> -> vector<8x32xf32>
      %c0_13 = arith.constant 0 : index
      %c0_14 = arith.constant 0 : index
      %13 = vector.load %arg4[%c0_13, %c0_14] : memref<1x32xf32, #tpu.memory_space<vmem>>, vector<1x32xf32>
      %14 = vector.broadcast %13 : vector<1x32xf32> to vector<8x32xf32>
      %15 = arith.addf %12, %14 : vector<8x32xf32>
      %cst_15 = arith.constant 0.000000e+00 : f32
      %16 = vector.broadcast %cst_15 : f32 to vector<8x32xf32>
      %17 = arith.maximumf %15, %16 : vector<8x32xf32>
      %c0_16 = arith.constant 0 : index
      %c0_17 = arith.constant 0 : index
      %18 = vector.load %arg8[%c0_16, %c0_17] : memref<8x32xf32, #tpu.memory_space<vmem>>, vector<8x32xf32>
      tpu.vector_store %arg8[%c0_16, %c0_17], %17 {strides = array<i32>} : memref<8x32xf32, #tpu.memory_space<vmem>>, vector<8x32xf32>,
    } else {
    }
    %c0 = arith.constant 0 : index
    %c0_1 = arith.constant 0 : index
    %3 = vector.load %arg8[%c0, %c0_1] : memref<8x32xf32, #tpu.memory_space<vmem>>, vector<8x32xf32>
    %c0_2 = arith.constant 0 : index
    %c0_3 = arith.constant 0 : index
    %4 = vector.load %arg5[%c0_2, %c0_3] : memref<32x512xf32, #tpu.memory_space<vmem>>, vector<32x512xf32>
    %cst = arith.constant dense<0.000000e+00> : vector<8x512xf32>
    %5 = tpu.matmul %3, %4, %cst {dimension_numbers = #tpu.dot_dimension_numbers<[1], [0], [0], [1], [0, 0, 1, 1], [], []>} : vector<8x32xf32>, vector<32x512xf32>, vector<8x512xf32> -> vector<8x512xf32>
    %c0_4 = arith.constant 0 : index
    %c0_5 = arith.constant 0 : index
    %6 = vector.load %arg6[%c0_4, %c0_5] : memref<1x512xf32, #tpu.memory_space<vmem>>, vector<1x512xf32>
    %7 = vector.broadcast %6 : vector<1x512xf32> to vector<8x512xf32>
    %8 = arith.addf %5, %7 : vector<8x512xf32>
    %c0_6 = arith.constant 0 : index
    %c0_7 = arith.constant 0 : index
    %9 = vector.load %arg7[%c0_6, %c0_7] : memref<8x512xf32, #tpu.memory_space<vmem>>, vector<8x512xf32>
    tpu.vector_store %arg7[%c0_6, %c0_7], %8 {strides = array<i32>} : memref<8x512xf32, #tpu.memory_space<vmem>>, vector<8x512xf32>,
    return
  }
  func.func @transform_0(%arg0: i32, %arg1: i32) -> (i32, i32) {
    %c0_i32 = arith.constant 0 : i32
    %c0_i32_0 = arith.constant 0 : i32
    return %arg0, %c0_i32 : i32, i32
  }
  func.func @transform_1(%arg0: i32, %arg1: i32) -> (i32, i32) {
    %c0_i32 = arith.constant 0 : i32
    %c0_i32_0 = arith.constant 0 : i32
    %c0_i32_1 = arith.constant 0 : i32
    return %c0_i32, %c0_i32_0 : i32, i32
  }
  func.func @transform_2(%arg0: i32, %arg1: i32) -> (i32, i32) {
    %c0_i32 = arith.constant 0 : i32
    %c0_i32_0 = arith.constant 0 : i32
    %c0_i32_1 = arith.constant 0 : i32
    return %c0_i32, %c0_i32_0 : i32, i32
  }
  func.func @transform_3(%arg0: i32, %arg1: i32) -> (i32, i32) {
    %c0_i32 = arith.constant 0 : i32
    %c0_i32_0 = arith.constant 0 : i32
    return %c0_i32, %arg1 : i32, i32
  }
  func.func @transform_4(%arg0: i32, %arg1: i32) -> (i32, i32) {
    %c0_i32 = arith.constant 0 : i32
    %c0_i32_0 = arith.constant 0 : i32
    return %c0_i32, %arg1 : i32, i32
  }
  func.func @transform_5(%arg0: i32, %arg1: i32) -> (i32, i32) {
    %c0_i32 = arith.constant 0 : i32
    return %arg0, %arg1 : i32, i32
  }
}

module attributes {stable_mosaic.version = 11 : i64} {
  func.func @_head_kernel_concat(%arg0: i32, %arg1: i32, %arg2: memref<8x64xf32, #tpu.memory_space<vmem>>, %arg3: memref<64x32xf32, #tpu.memory_space<vmem>>, %arg4: memref<1x32xf32, #tpu.memory_space<vmem>>, %arg5: memref<32x512xf32, #tpu.memory_space<vmem>>, %arg6: memref<1x512xf32, #tpu.memory_space<vmem>>, %arg7: memref<8x512xf32, #tpu.memory_space<vmem>>, %arg8: memref<8x32xf32, #tpu.memory_space<vmem>>) attributes {dimension_semantics = [#tpu.dimension_semantics<parallel>, #tpu.dimension_semantics<arbitrary>], iteration_bounds = array<i64: 1, 2>, scalar_prefetch = 0 : i64, scratch_operands = 1 : i64, tpu.core_type = #tpu.core_type<tc>, window_params = [{transform_indices = @transform_0, window_bounds = array<i64: 8, 64>}, {pipeline_mode = #tpu.pipeline_mode<synchronous>, transform_indices = @transform_1, window_bounds = array<i64: 64, 32>}, {pipeline_mode = #tpu.pipeline_mode<synchronous>, transform_indices = @transform_2, window_bounds = array<i64: 1, 32>}, {transform_indices = @transform_3, window_bounds = array<i64: 32, 512>}, {transform_indices = @transform_4, window_bounds = array<i64: 1, 512>}, {transform_indices = @transform_5, window_bounds = array<i64: 8, 512>}]} {
    %c0_i32 = arith.constant 0 : i32
    %0 = arith.cmpi eq, %arg1, %c0_i32 : i32
    %1 = arith.extui %0 : i1 to i32
    %c0_i32_0 = arith.constant 0 : i32
    %2 = arith.cmpi ne, %1, %c0_i32_0 : i32
    scf.if %2 {
      %c0_8 = arith.constant 0 : index
      %c0_9 = arith.constant 0 : index
      %10 = vector.load %arg2[%c0_8, %c0_9] : memref<8x64xf32, #tpu.memory_space<vmem>>, vector<8x64xf32>
      %c0_10 = arith.constant 0 : index
      %c0_11 = arith.constant 0 : index
      %11 = vector.load %arg3[%c0_10, %c0_11] : memref<64x32xf32, #tpu.memory_space<vmem>>, vector<64x32xf32>
      %cst_12 = arith.constant dense<0.000000e+00> : vector<8x32xf32>
      %12 = tpu.matmul %10, %11, %cst_12 {dimension_numbers = #tpu.dot_dimension_numbers<[1], [0], [0], [1], [0, 0, 1, 1], [], []>} : vector<8x64xf32>, vector<64x32xf32>, vector<8x32xf32> -> vector<8x32xf32>
      %c0_13 = arith.constant 0 : index
      %c0_14 = arith.constant 0 : index
      %13 = vector.load %arg4[%c0_13, %c0_14] : memref<1x32xf32, #tpu.memory_space<vmem>>, vector<1x32xf32>
      %14 = vector.broadcast %13 : vector<1x32xf32> to vector<8x32xf32>
      %15 = arith.addf %12, %14 : vector<8x32xf32>
      %cst_15 = arith.constant 0.000000e+00 : f32
      %16 = vector.broadcast %cst_15 : f32 to vector<8x32xf32>
      %17 = arith.maximumf %15, %16 : vector<8x32xf32>
      %c0_16 = arith.constant 0 : index
      %c0_17 = arith.constant 0 : index
      %18 = vector.load %arg8[%c0_16, %c0_17] : memref<8x32xf32, #tpu.memory_space<vmem>>, vector<8x32xf32>
      tpu.vector_store %arg8[%c0_16, %c0_17], %17 {strides = array<i32>} : memref<8x32xf32, #tpu.memory_space<vmem>>, vector<8x32xf32>,
    } else {
    }
    %c0 = arith.constant 0 : index
    %c0_1 = arith.constant 0 : index
    %3 = vector.load %arg8[%c0, %c0_1] : memref<8x32xf32, #tpu.memory_space<vmem>>, vector<8x32xf32>
    %c0_2 = arith.constant 0 : index
    %c0_3 = arith.constant 0 : index
    %4 = vector.load %arg5[%c0_2, %c0_3] : memref<32x512xf32, #tpu.memory_space<vmem>>, vector<32x512xf32>
    %cst = arith.constant dense<0.000000e+00> : vector<8x512xf32>
    %5 = tpu.matmul %3, %4, %cst {dimension_numbers = #tpu.dot_dimension_numbers<[1], [0], [0], [1], [0, 0, 1, 1], [], []>} : vector<8x32xf32>, vector<32x512xf32>, vector<8x512xf32> -> vector<8x512xf32>
    %c0_4 = arith.constant 0 : index
    %c0_5 = arith.constant 0 : index
    %6 = vector.load %arg6[%c0_4, %c0_5] : memref<1x512xf32, #tpu.memory_space<vmem>>, vector<1x512xf32>
    %7 = vector.broadcast %6 : vector<1x512xf32> to vector<8x512xf32>
    %8 = arith.addf %5, %7 : vector<8x512xf32>
    %c0_6 = arith.constant 0 : index
    %c0_7 = arith.constant 0 : index
    %9 = vector.load %arg7[%c0_6, %c0_7] : memref<8x512xf32, #tpu.memory_space<vmem>>, vector<8x512xf32>
    tpu.vector_store %arg7[%c0_6, %c0_7], %8 {strides = array<i32>} : memref<8x512xf32, #tpu.memory_space<vmem>>, vector<8x512xf32>,
    return
  }
  func.func @transform_0(%arg0: i32, %arg1: i32) -> (i32, i32) {
    %c0_i32 = arith.constant 0 : i32
    %c0_i32_0 = arith.constant 0 : i32
    return %arg0, %c0_i32 : i32, i32
  }
  func.func @transform_1(%arg0: i32, %arg1: i32) -> (i32, i32) {
    %c0_i32 = arith.constant 0 : i32
    %c0_i32_0 = arith.constant 0 : i32
    %c0_i32_1 = arith.constant 0 : i32
    return %c0_i32, %c0_i32_0 : i32, i32
  }
  func.func @transform_2(%arg0: i32, %arg1: i32) -> (i32, i32) {
    %c0_i32 = arith.constant 0 : i32
    %c0_i32_0 = arith.constant 0 : i32
    %c0_i32_1 = arith.constant 0 : i32
    return %c0_i32, %c0_i32_0 : i32, i32
  }
  func.func @transform_3(%arg0: i32, %arg1: i32) -> (i32, i32) {
    %c0_i32 = arith.constant 0 : i32
    %c0_i32_0 = arith.constant 0 : i32
    return %c0_i32, %arg1 : i32, i32
  }
  func.func @transform_4(%arg0: i32, %arg1: i32) -> (i32, i32) {
    %c0_i32 = arith.constant 0 : i32
    %c0_i32_0 = arith.constant 0 : i32
    return %c0_i32, %arg1 : i32, i32
  }
  func.func @transform_5(%arg0: i32, %arg1: i32) -> (i32, i32) {
    %c0_i32 = arith.constant 0 : i32
    return %arg0, %arg1 : i32, i32
  }
}

</mosaic_0001>

<bundles_post_ra>
// kernel: tpu_custom_call.1
= control target key start
LH: loop header
LB: loop body
LE: loop exit
PB: predicated region body
PF: predicated region fallthrough
CT: control target
= control target key end

     0   :  { %10 = vsyncpa [#allocation4], 0  ;;  %s1176_s0 = inlined_call_operand.vmem [shape: f32[8,64], index: 0, kind: input, shape index: {}]   ;;  %s1177_s1 = inlined_call_operand.vmem [shape: f32[64,32], index: 1, kind: input, shape index: {}]   ;;  %s1178_s2 = inlined_call_operand.vmem [shape: f32[1,32], index: 2, kind: input, shape index: {}]   ;;  %s1179_s3 = inlined_call_operand.hbm [shape: f32[32,1024], index: 3, kind: input, shape index: {}]   ;;  %s1180_s4 = inlined_call_operand.vmem [shape: f32[1,1024], index: 4, kind: input, shape index: {}]   ;;  %s1181_s5 = inlined_call_operand.hbm [shape: f32[8,1024], index: 5, kind: output, shape index: {}]  }
   0x1   :  { %12 = vsyncpa [#allocation4 + $0x1], 0 }
   0x2   :  { %13 = vsyncpa [#allocation5], 0 }
   0x3   :  { %15 = vsyncpa [#allocation5 + $0x1], 0  ;;  %s971_s18 = smov 0   ;;  %s973_s19 = smov 0  }
   0x4   :  { %s975_s20 = smov 0   ;;  %s977_s21 = smov 0  }
   0x5   :  { %s979_s22 = smov 0   ;;  %s981_s23 = smov 0  }
   0x6 LB: > { %s703_s24 = sadd.s32 4294967295, %s931_s23   ;;  %s704_s25 = sadd.s32 4294967294, %s931_s23   ;;  %s931_s23 = sphi %s981_s23, %s21_s23   ;;  %s927_s22 = sphi %s979_s22, %s1192_s22   ;;  %s923_s21 = sphi %s977_s21, %s1191_s21   ;;  %s919_s20 = sphi %s975_s20, %s1190_s20   ;;  %s915_s19 = sphi %s973_s19, %s1189_s19   ;;  %s911_s18 = sphi %s971_s18, %s1188_s18  }
   0x7   : > { %s30_s26 = sadd.s32 1, %s927_s22  ;;  %s108_s27 = sadd.s32 1, %s919_s20 }
   0x8   : > { %p31_p0 = scmp.ge.s32.totalorder %s30_s26, 2  ;;  %p115_p1 = scmp.ne.s32.totalorder %s919_s20, %s915_s19 }
   0x9   : > { %p116_p2 = scmp.eq.s32.totalorder %s931_s23, 0  ;;  %p121_p3 = scmp.ne.s32.totalorder %s915_s19, %s911_s18 }
   0xa   : > { %s1194_s26 = smov (%p31_p0, %s30_s26), 0  ;;  %p122_p5 = scmp.eq.s32.totalorder %s703_s24, 0 }
   0xb   : > { %p1012_p4 = por %p116_p2, %p115_p1  ;;  %s105_s29 = ssub.s32 %s927_s22, %s1194_s26 }
   0xc   : > { %p173_p6 = scmp.eq.s32.totalorder %s703_s24, 1  ;;  %p106_p7 = scmp.eq.s32.totalorder %s105_s29, 0 }
   0xd   : > { %p1018_p8 = por %p122_p5, %p121_p3  ;;  %p179_p10 = scmp.eq.s32.totalorder %s704_s25, 1 }
   0xe   : > { %p1022_p9 = por %p173_p6, %p115_p1  ;;  %p767_p13 = scmp.lt.s32.totalorder %s931_s23, 2 }
   0xf   : > { %s1027_s7 = scalar_select %p106_p7, %s919_s20, %s108_s27  }
  0x10   : > { %p1029_p11 = por %p179_p10, %p121_p3  ;;  %s212_s9 = sand.u32 1, %s919_s20  }
  0x11   : > { %s708_s10 = sshll.u32 %s212_s9, 7  ;;  %s725_s11 = sshll.u32 %s927_s22, 9 }
  0x12   : > { %s222_s14 = scalar_lea.hbm %s1179_s3, %s725_s11  ;;  %s216_s15 = scalar_lea.vmem [#allocation3], %s708_s10 }
  0x13   : > { %s223_s16 = sshll.u32 %s216_s15, 4  ;;  %p1042_p0 = pnand %p767_p13, %p1012_p4  ;;  %s224_s16 = int_to_ptr.vmem [resolvable:$true] %s223_s16 }
  0x14   : > { %s213_s24 = scalar_lea.sflag [#allocation4], %s212_s9  ;;  %s836_s25 = scalar_lea.vmem %s224_s16, 2048 }
  0x15   : > { %p825_p1 = pneg %p1042_p0  ;;  %p837_p2 = scmp.ne.s32.totalorder %s224_s16, %s836_s25 }
  0x16   : > { %s933_s27 = smov [#allocation3]  }
  0x17   : > { %p839_p3 = pnand %p837_p2, %p825_p1  ;;  %s841_s29 = sshll.u32 %s933_s27, 4  ;;  %s842_s29 = int_to_ptr.vmem [resolvable:$false] %s841_s29 }
  0x18   : > { %s843_s11 = scalar_lea.vmem %s842_s29, 4096  ;;  %p844_p6 = scmp.lt.s32.totalorder %s224_s16, %s842_s29 }
  0x19   : > { %p840_p5 = pneg %p839_p3  ;;  %p845_p7 = scmp.lt.s32.totalorder %s843_s11, %s836_s25 }
  0x1b   : > { %p846_p10 = por %p845_p7, %p844_p6 }
  0x1d   : > { %p847_p12 = pnand %p846_p10, %p840_p5 }
  0x1f   : > { %850 = shalt.err (!%p847_p12)
}
  0x20   : > { %s934_s28 = smov 1024   ;;  %s935_s9 = smov 512  }
  0x21   : > { %s936_s10 = smov 32   ;;  %p711_p4 = scmp.ge.s32.totalorder %s931_s23, 1 }
  0x22   : > { %762 = dma.hbm_to_vmem [thread:$0]  (!%p1042_p0), %s222_s14, 2048, %s224_s16, %s213_s24, %s934_s28, %s935_s9, %s936_s10  }
  0x23   : > { %p239_p13 = scmp.lt.s32.totalorder %s931_s23, 3 }
  0x25   : > { %p240_p1 = pnand %p711_p4, %p239_p13 }
  0x26   : > { %s1053_s12 = sand.u32 (!%p240_p1), 1, %s915_s19  }
  0x27   : > { %243 = sbr.rel (%p240_p1) target bundleno = 489 (0x1e9), region = 40  ;;  %s712_s13 = sshll.u32 (!%p240_p1), %s1053_s12, 7 }
  0x28   : > { %s246_s15 = scalar_lea.sflag (!%p240_p1), [#allocation4], %s1053_s12  ;;  %s1057_s25 = scalar_lea.vmem (!%p240_p1), [#allocation3], %s712_s13 }
  0x2c   : > { %902 = dma.done.wait (%p1018_p8), %s246_s15, 2048  }
  0x2d   : > { %904 = vsyncadd (%p1018_p8), %s246_s15, 4294965248  ;;  %s713_s14 = sshll.u32 %s1053_s12, 5  ;;  %s714_s16 = sshll.u32 %s923_s21, 2 }
  0x2e   : > { %p290_p12 = scmp.lt.s32.totalorder %s714_s16, 7  ;;  %s1071_s29 = scalar_lea.vmem [#allocation6], %s713_s14 }
  0x2f   : > { %p715_p0 = scmp.ne.s32.totalorder %s923_s21, 0 }
  0x30   : > { %s1196_s16 = smov (!%p290_p12, %s714_s16), 7 }
  0x31   : > { %s292_s27 = scalar_lea.vmem %s1180_s4, %s1196_s16  ;;  %298 = sbr.rel (%p715_p0) target bundleno = 269 (0x10d), region = 48 }
  0x36   : > { %v307_v0 = vld [vmem:[%s1177_s1 + $0x38] sm:$0xff]  ;;  %v937_v1 = vmov 0.0   ;;  %v306_v2 = vld [vmem:[%s1177_s1 + $0x30] sm:$0xff]  ;;  %vm938_vm0 = vmmov 0   ;;  %v305_v3 = vld [vmem:[%s1177_s1 + $0x28] sm:$0xff]  ;;  %vm315_vm1 = vcmask 523264  }
  0x37   : > { %736 = vmatprep.subr.mxu0 %v937_v1  ;;  %752 = vmatprep.mubr.msk.f32.mxu0 %vm938_vm0, %v937_v1  ;;  %v304_v4 = vld [vmem:[%s1177_s1 + $0x20] sm:$0xff]  ;;  %v303_v5 = vld [vmem:[%s1177_s1 + $0x18] sm:$0xff]  ;;  %v302_v6 = vld [vmem:[%s1177_s1 + $0x10] sm:$0xff]  ;;  %vm390_vm2 = vcmask 261120  }
  0x38   : > { %737 = vmatpush3.msra.mxu0 %v307_v0  ;;  %v301_v7 = vld [vmem:[%s1177_s1 + $0x8] sm:$0xff]  ;;  %v300_v8 = vld [vmem:[%s1177_s1] sm:$0xff] }
  0x39   : > { %738 = vmatprep.subr.mxu0 %v937_v1  ;;  %v299_v9 = vld [vmem:[%s1176_s0] sm:$0xff] }
  0x3a   : > { %739 = vmatpush3.msra.mxu0 %v306_v2  ;;  %v716_v10 = vld [vmem:[%s1178_s2] ss:$0 sm:$0xff] }
  0x3b   : > { %740 = vmatprep.subr.mxu0 %v937_v1 }
  0x3c   : > { %741 = vmatpush3.msra.mxu0 %v305_v3 }
  0x3d   : > { %742 = vmatprep.subr.mxu0 %v937_v1 }
  0x3e   : > { %743 = vmatpush3.msra.mxu0 %v304_v4 }
  0x3f   : > { %744 = vmatprep.subr.mxu0 %v937_v1 }
  0x40   : > { %745 = vmatpush3.msra.mxu0 %v303_v5 }
  0x41   : > { %746 = vmatprep.subr.mxu0 %v937_v1 }
  0x42   : > { %747 = vmatpush3.msra.mxu0 %v302_v6 }
  0x43   : > { %748 = vmatprep.subr.mxu0 %v937_v1 }
  0x44   : > { %749 = vmatpush3.msra.mxu0 %v301_v7 }
  0x45   : > { %750 = vmatprep.subr.mxu0 %v937_v1 }
  0x46   : > { %751 = vmatpush3.msra.mxu0 %v300_v8 }
  0x47   : > { %753 = vmatmul.mubr.msk.f32.vlgmr.msra.gmra.mxu0 %vm315_vm1, %v299_v9 }
 0x107   : > { %v385_v11 = vpop.f32.mrf.mxu0 }
 0x108   : > { %v386_v12 = vadd.f32 %v716_v10, %v385_v11 }
 0x109   : > { %v754_v13 = vpop.f32.mrf.mxu0 }
 0x10a   : > { %v389_v14 = vmax.f32 %v386_v12, 0.0 }
 0x10c   : > { %391 = vst.msk [vmem:[#allocation2] sm:$0xff] %vm390_vm2, %v389_v14 }
 0x10d PF: > { %v406_v15 = vld [vmem:[%s1057_s25 + $0x68] sm:$0xff]  ;;  %v408_v16 = vld [vmem:[%s1057_s25 + $0x78] sm:$0xff]  ;;  %v405_v17 = vld [vmem:[%s1057_s25 + $0x60] sm:$0xff]  ;;  %vm431_vm3 = vcmask 261120   ;;  %v939_v32 = vmov 0.0   ;;  %v411_v33 = vlaneseq  ;;  %s726_s30 = sshll.u32 %s923_s21, 9 }
 0x10e   : > { %459 = vmatprep.subr.mxu0 %v406_v15  ;;  %530 = vmatprep.subr.mxu1 %v408_v16  ;;  %v407_v18 = vld [vmem:[%s1057_s25 + $0x70] sm:$0xff]  ;;  %v402_v19 = vld [vmem:[%s1057_s25 + $0x48] sm:$0xff]  ;;  %v404_v20 = vld [vmem:[%s1057_s25 + $0x58] sm:$0xff]  ;;  %s598_s28 = sshll.u32 %s1071_s29, 4  ;;  %s1132_s9 = scalar_lea.hbm %s1181_s5, %s726_s30  ;;  %s599_s28 = int_to_ptr.vmem [resolvable:$true] %s598_s28 }
 0x10f   : > { %460 = vmatpush1.msra.mxu0 %v405_v17  ;;  %531 = vmatpush1.msra.mxu1 %v407_v18  ;;  %v401_v21 = vld [vmem:[%s1057_s25 + $0x40] sm:$0xff]  ;;  %v403_v22 = vld [vmem:[%s1057_s25 + $0x50] sm:$0xff]  ;;  %v398_v23 = vld [vmem:[%s1057_s25 + $0x28] sm:$0xff]  ;;  %v412_v34 = vshrl.u32 %v411_v33, 7  ;;  %s582_s10 = scalar_lea.sflag [#allocation5], %s1053_s12  ;;  %s851_s21 = scalar_lea.vmem %s599_s28, 512 }
 0x110   : > { %461 = vmatprep.subr.mxu0 %v402_v19  ;;  %532 = vmatprep.subr.mxu1 %v404_v20  ;;  %v400_v24 = vld [vmem:[%s1057_s25 + $0x38] sm:$0xff]  ;;  %v397_v25 = vld [vmem:[%s1057_s25 + $0x20] sm:$0xff]  ;;  %v399_v26 = vld [vmem:[%s1057_s25 + $0x30] sm:$0xff]  ;;  %p852_p8 = scmp.ne.s32.totalorder %s599_s28, %s851_s21  ;;  %s940_s13 = smov [#allocation6]  }
 0x111   : > { %462 = vmatpush1.msra.mxu0 %v401_v21  ;;  %533 = vmatpush1.msra.mxu1 %v403_v22  ;;  %v394_v27 = vld [vmem:[%s1057_s25 + $0x8] sm:$0xff]  ;;  %v396_v28 = vld [vmem:[%s1057_s25 + $0x18] sm:$0xff]  ;;  %v393_v29 = vld [vmem:[%s1057_s25] sm:$0xff]  ;;  %v413_v35 = vsub.s32 0, %v412_v34  ;;  %v421_v36 = vsub.s32 2, %v412_v34  ;;  %v417_v38 = vsub.s32 1, %v412_v34 }
 0x112   : > { %463 = vmatprep.subr.mxu0 %v398_v23  ;;  %534 = vmatprep.subr.mxu1 %v400_v24  ;;  %v395_v30 = vld [vmem:[%s1057_s25 + $0x10] sm:$0xff]  ;;  %v409_v37 = vld [vmem:[%s292_s27] sm:$0xf]  ;;  %v425_v39 = vsub.s32 3, %v412_v34  ;;  %p853_p2 = pnand %p852_p8, %p1022_p9  ;;  %s855_s15 = sshll.u32 %s940_s13, 4  ;;  %s856_s15 = int_to_ptr.vmem [resolvable:$false] %s855_s15 }
 0x113   : > { %464 = vmatpush1.msra.mxu0 %v397_v25  ;;  %535 = vmatpush1.msra.mxu1 %v399_v26  ;;  %v392_v31 = vld [vmem:[#allocation2] sm:$0xff]  ;;  %v414_v40 = vrot.slane %v409_v37, %v413_v35  ;;  %v422_v41 = vrot.slane %v409_v37, %v421_v36  ;;  %v418_v42 = vrot.slane %v409_v37, %v417_v38  ;;  %s857_s14 = scalar_lea.vmem %s856_s15, 1024  ;;  %p858_p5 = scmp.lt.s32.totalorder %s599_s28, %s856_s15 }
 0x114   : > { %465 = vmatprep.subr.mxu0 %v394_v27  ;;  %536 = vmatprep.subr.mxu1 %v396_v28  ;;  %v426_v43 = vrot.slane %v409_v37, %v425_v39  ;;  %p854_p3 = pneg %p853_p2  ;;  %p859_p6 = scmp.lt.s32.totalorder %s857_s14, %s851_s21 }
 0x115   : > { %466 = vmatpush1.msra.mxu0 %v393_v29  ;;  %499 = vmatprep.mubr.f32.mxu0 %v939_v32 }
 0x116   : > { %537 = vmatpush1.msra.mxu1 %v395_v30  ;;  %570 = vmatprep.mubr.f32.mxu1 %v939_v32  ;;  %p860_p7 = por %p859_p6, %p858_p5 }
 0x117   : > { %718 = vmatmul.mubr.msk.f32.vlgmr.msra.gmra.mxu0 %vm431_vm3, %v392_v31  ;;  %719 = vmatmul.mubr.msk.f32.vlgmr.msra.gmra.mxu1 %vm431_vm3, %v392_v31 }
 0x118   : > { %p861_p10 = pnand %p860_p7, %p854_p3 }
 0x1d7   : > { %v501_v44 = vpop.f32.mrf.mxu0  ;;  %v572_v45 = vpop.f32.mrf.mxu1 }
 0x1d8   : > { %v502_v46 = vadd.f32 %v501_v44, %v414_v40  ;;  %v573_v47 = vadd.f32 %v572_v45, %v422_v41 }
 0x1d9   : > { %v503_v48 = vpop.f32.mrf.mxu0  ;;  %v574_v49 = vpop.f32.mrf.mxu1 }
 0x1da   : > { %577 = vst [vmem:[%s1071_s29] sm:$0xff] %v502_v46  ;;  %579 = vst [vmem:[%s1071_s29 + $0x10] sm:$0xff] %v573_v47  ;;  %v504_v50 = vadd.f32 %v503_v48, %v418_v42  ;;  %v575_v51 = vadd.f32 %v574_v49, %v426_v43 }
 0x1dc   : > { %578 = vst [vmem:[%s1071_s29 + $0x8] sm:$0xff] %v504_v50  ;;  %580 = vst [vmem:[%s1071_s29 + $0x18] sm:$0xff] %v575_v51 }
 0x1dd   : > { %864 = shalt.err (!%p861_p10)
}
 0x1de   : > { %s865_s29 = scalar_lea.hbm %s1132_s9, 512  ;;  %s869_s24 = scalar_lea.hbm %s1181_s5, 1024 }
 0x1df   : > { %p866_p4 = scmp.ne.s32.totalorder %s1132_s9, %s865_s29  ;;  %p870_p12 = scmp.lt.s32.totalorder %s1132_s9, %s1181_s5 }
 0x1e0   : > { %p871_p0 = scmp.lt.s32.totalorder %s869_s24, %s865_s29 }
 0x1e1   : > { %p867_p13 = pnand %p866_p4, %p1022_p9 }
 0x1e2   : > { %p872_p8 = por %p871_p0, %p870_p12 }
 0x1e3   : > { %p868_p1 = pneg %p867_p13 }
 0x1e5   : > { %p873_p2 = pnand %p872_p8, %p868_p1 }
 0x1e7   : > { %876 = shalt.err (!%p873_p2)
}
 0x1e8   : > { %757 = dma.vmem_to_hbm [thread:$0]  (%p1022_p9), %s599_s28, 512, %s1132_s9, %s582_s10  }
 0x1e9 PF: > { %s610_s30 = sand.u32 1, %s911_s18   ;;  %p1187_p3 = scmp.ge.s32.totalorder %s931_s23, 2 }
 0x1ea   : > { %s611_s16 = scalar_lea.sflag [#allocation5], %s610_s30 }
 0x1eb   : > { %p764_p5 = pnand %p1187_p3, %p1029_p11 }
 0x1ed   : > { %p765_p6 = pneg %p764_p5 }
 0x1ef   : > { %906 = dma.done.wait (%p765_p6), %s611_s16, 512  }
 0x1f0   : > { %908 = vsyncadd (%p765_p6), %s611_s16, 4294966784  ;;  %s21_s23 = sadd.s32 1, %s931_s23   ;;  %s1188_s18 = smov %s915_s19 }
 0x1f1   : > { %p18_p7 = scmp.ge.s32.totalorder %s21_s23, 4   ;;  %s1189_s19 = smov %s919_s20 }
 0x1f2   : > { %s1190_s20 = smov %s1027_s7  ;;  %s1191_s21 = smov %s927_s22 }
 0x1f3   : > { %s1192_s22 = smov %s1194_s26  ;;  %20 = sbr.rel (!%p18_p7) target bundleno = 6 (0x6), region = 95 }
 0x1f8   :  { %616 = vsyncpa [#allocation4], 1 }
 0x1f9   :  { %618 = vsyncpa [#allocation4 + $0x1], 1 }
 0x1fa   :  { %619 = vsyncpa [#allocation5], 1 }
 0x1fb   :  { %621 = vsyncpa [#allocation5 + $0x1], 1 }

// kernel: tpu_custom_call.1
= control target key start
LH: loop header
LB: loop body
LE: loop exit
PB: predicated region body
PF: predicated region fallthrough
CT: control target
= control target key end

     0   :  { %10 = vsyncpa [#allocation4], 0  ;;  %s1176_s0 = inlined_call_operand.vmem [shape: f32[8,64], index: 0, kind: input, shape index: {}]   ;;  %s1177_s1 = inlined_call_operand.vmem [shape: f32[64,32], index: 1, kind: input, shape index: {}]   ;;  %s1178_s2 = inlined_call_operand.vmem [shape: f32[1,32], index: 2, kind: input, shape index: {}]   ;;  %s1179_s3 = inlined_call_operand.hbm [shape: f32[32,1024], index: 3, kind: input, shape index: {}]   ;;  %s1180_s4 = inlined_call_operand.vmem [shape: f32[1,1024], index: 4, kind: input, shape index: {}]   ;;  %s1181_s5 = inlined_call_operand.hbm [shape: f32[8,1024], index: 5, kind: output, shape index: {}]  }
   0x1   :  { %12 = vsyncpa [#allocation4 + $0x1], 0 }
   0x2   :  { %13 = vsyncpa [#allocation5], 0 }
   0x3   :  { %15 = vsyncpa [#allocation5 + $0x1], 0  ;;  %s971_s18 = smov 0   ;;  %s973_s19 = smov 0  }
   0x4   :  { %s975_s20 = smov 0   ;;  %s977_s21 = smov 0  }
   0x5   :  { %s979_s22 = smov 0   ;;  %s981_s23 = smov 0  }
   0x6 LB: > { %s703_s24 = sadd.s32 4294967295, %s931_s23   ;;  %s704_s25 = sadd.s32 4294967294, %s931_s23   ;;  %s931_s23 = sphi %s981_s23, %s21_s23   ;;  %s927_s22 = sphi %s979_s22, %s1192_s22   ;;  %s923_s21 = sphi %s977_s21, %s1191_s21   ;;  %s919_s20 = sphi %s975_s20, %s1190_s20   ;;  %s915_s19 = sphi %s973_s19, %s1189_s19   ;;  %s911_s18 = sphi %s971_s18, %s1188_s18  }
   0x7   : > { %s30_s26 = sadd.s32 1, %s927_s22  ;;  %s108_s27 = sadd.s32 1, %s919_s20 }
   0x8   : > { %p31_p0 = scmp.ge.s32.totalorder %s30_s26, 2  ;;  %p115_p1 = scmp.ne.s32.totalorder %s919_s20, %s915_s19 }
   0x9   : > { %p116_p2 = scmp.eq.s32.totalorder %s931_s23, 0  ;;  %p121_p3 = scmp.ne.s32.totalorder %s915_s19, %s911_s18 }
   0xa   : > { %s1194_s26 = smov (%p31_p0, %s30_s26), 0  ;;  %p122_p5 = scmp.eq.s32.totalorder %s703_s24, 0 }
   0xb   : > { %p1012_p4 = por %p116_p2, %p115_p1  ;;  %s105_s29 = ssub.s32 %s927_s22, %s1194_s26 }
   0xc   : > { %p173_p6 = scmp.eq.s32.totalorder %s703_s24, 1  ;;  %p106_p7 = scmp.eq.s32.totalorder %s105_s29, 0 }
   0xd   : > { %p1018_p8 = por %p122_p5, %p121_p3  ;;  %p179_p10 = scmp.eq.s32.totalorder %s704_s25, 1 }
   0xe   : > { %p1022_p9 = por %p173_p6, %p115_p1  ;;  %p767_p13 = scmp.lt.s32.totalorder %s931_s23, 2 }
   0xf   : > { %s1027_s7 = scalar_select %p106_p7, %s919_s20, %s108_s27  }
  0x10   : > { %p1029_p11 = por %p179_p10, %p121_p3  ;;  %s212_s9 = sand.u32 1, %s919_s20  }
  0x11   : > { %s708_s10 = sshll.u32 %s212_s9, 7  ;;  %s725_s11 = sshll.u32 %s927_s22, 9 }
  0x12   : > { %s222_s14 = scalar_lea.hbm %s1179_s3, %s725_s11  ;;  %s216_s15 = scalar_lea.vmem [#allocation3], %s708_s10 }
  0x13   : > { %s223_s16 = sshll.u32 %s216_s15, 4  ;;  %p1042_p0 = pnand %p767_p13, %p1012_p4  ;;  %s224_s16 = int_to_ptr.vmem [resolvable:$true] %s223_s16 }
  0x14   : > { %s213_s24 = scalar_lea.sflag [#allocation4], %s212_s9  ;;  %s836_s25 = scalar_lea.vmem %s224_s16, 2048 }
  0x15   : > { %p825_p1 = pneg %p1042_p0  ;;  %p837_p2 = scmp.ne.s32.totalorder %s224_s16, %s836_s25 }
  0x16   : > { %s933_s27 = smov [#allocation3]  }
  0x17   : > { %p839_p3 = pnand %p837_p2, %p825_p1  ;;  %s841_s29 = sshll.u32 %s933_s27, 4  ;;  %s842_s29 = int_to_ptr.vmem [resolvable:$false] %s841_s29 }
  0x18   : > { %s843_s11 = scalar_lea.vmem %s842_s29, 4096  ;;  %p844_p6 = scmp.lt.s32.totalorder %s224_s16, %s842_s29 }
  0x19   : > { %p840_p5 = pneg %p839_p3  ;;  %p845_p7 = scmp.lt.s32.totalorder %s843_s11, %s836_s25 }
  0x1b   : > { %p846_p10 = por %p845_p7, %p844_p6 }
  0x1d   : > { %p847_p12 = pnand %p846_p10, %p840_p5 }
  0x1f   : > { %850 = shalt.err (!%p847_p12)
}
  0x20   : > { %s934_s28 = smov 1024   ;;  %s935_s9 = smov 512  }
  0x21   : > { %s936_s10 = smov 32   ;;  %p711_p4 = scmp.ge.s32.totalorder %s931_s23, 1 }
  0x22   : > { %762 = dma.hbm_to_vmem [thread:$0]  (!%p1042_p0), %s222_s14, 2048, %s224_s16, %s213_s24, %s934_s28, %s935_s9, %s936_s10  }
  0x23   : > { %p239_p13 = scmp.lt.s32.totalorder %s931_s23, 3 }
  0x25   : > { %p240_p1 = pnand %p711_p4, %p239_p13 }
  0x26   : > { %s1053_s12 = sand.u32 (!%p240_p1), 1, %s915_s19  }
  0x27   : > { %243 = sbr.rel (%p240_p1) target bundleno = 489 (0x1e9), region = 40  ;;  %s712_s13 = sshll.u32 (!%p240_p1), %s1053_s12, 7 }
  0x28   : > { %s246_s15 = scalar_lea.sflag (!%p240_p1), [#allocation4], %s1053_s12  ;;  %s1057_s25 = scalar_lea.vmem (!%p240_p1), [#allocation3], %s712_s13 }
  0x2c   : > { %902 = dma.done.wait (%p1018_p8), %s246_s15, 2048  }
  0x2d   : > { %904 = vsyncadd (%p1018_p8), %s246_s15, 4294965248  ;;  %s713_s14 = sshll.u32 %s1053_s12, 5  ;;  %s714_s16 = sshll.u32 %s923_s21, 2 }
  0x2e   : > { %p290_p12 = scmp.lt.s32.totalorder %s714_s16, 7  ;;  %s1071_s29 = scalar_lea.vmem [#allocation6], %s713_s14 }
  0x2f   : > { %p715_p0 = scmp.ne.s32.totalorder %s923_s21, 0 }
  0x30   : > { %s1196_s16 = smov (!%p290_p12, %s714_s16), 7 }
  0x31   : > { %s292_s27 = scalar_lea.vmem %s1180_s4, %s1196_s16  ;;  %298 = sbr.rel (%p715_p0) target bundleno = 269 (0x10d), region = 48 }
  0x36   : > { %v307_v0 = vld [vmem:[%s1177_s1 + $0x38] sm:$0xff]  ;;  %v937_v1 = vmov 0.0   ;;  %v306_v2 = vld [vmem:[%s1177_s1 + $0x30] sm:$0xff]  ;;  %vm938_vm0 = vmmov 0   ;;  %v305_v3 = vld [vmem:[%s1177_s1 + $0x28] sm:$0xff]  ;;  %vm315_vm1 = vcmask 523264  }
  0x37   : > { %736 = vmatprep.subr.mxu0 %v937_v1  ;;  %752 = vmatprep.mubr.msk.f32.mxu0 %vm938_vm0, %v937_v1  ;;  %v304_v4 = vld [vmem:[%s1177_s1 + $0x20] sm:$0xff]  ;;  %v303_v5 = vld [vmem:[%s1177_s1 + $0x18] sm:$0xff]  ;;  %v302_v6 = vld [vmem:[%s1177_s1 + $0x10] sm:$0xff]  ;;  %vm390_vm2 = vcmask 261120  }
  0x38   : > { %737 = vmatpush3.msra.mxu0 %v307_v0  ;;  %v301_v7 = vld [vmem:[%s1177_s1 + $0x8] sm:$0xff]  ;;  %v300_v8 = vld [vmem:[%s1177_s1] sm:$0xff] }
  0x39   : > { %738 = vmatprep.subr.mxu0 %v937_v1  ;;  %v299_v9 = vld [vmem:[%s1176_s0] sm:$0xff] }
  0x3a   : > { %739 = vmatpush3.msra.mxu0 %v306_v2  ;;  %v716_v10 = vld [vmem:[%s1178_s2] ss:$0 sm:$0xff] }
  0x3b   : > { %740 = vmatprep.subr.mxu0 %v937_v1 }
  0x3c   : > { %741 = vmatpush3.msra.mxu0 %v305_v3 }
  0x3d   : > { %742 = vmatprep.subr.mxu0 %v937_v1 }
  0x3e   : > { %743 = vmatpush3.msra.mxu0 %v304_v4 }
  0x3f   : > { %744 = vmatprep.subr.mxu0 %v937_v1 }
  0x40   : > { %745 = vmatpush3.msra.mxu0 %v303_v5 }
  0x41   : > { %746 = vmatprep.subr.mxu0 %v937_v1 }
  0x42   : > { %747 = vmatpush3.msra.mxu0 %v302_v6 }
  0x43   : > { %748 = vmatprep.subr.mxu0 %v937_v1 }
  0x44   : > { %749 = vmatpush3.msra.mxu0 %v301_v7 }
  0x45   : > { %750 = vmatprep.subr.mxu0 %v937_v1 }
  0x46   : > { %751 = vmatpush3.msra.mxu0 %v300_v8 }
  0x47   : > { %753 = vmatmul.mubr.msk.f32.vlgmr.msra.gmra.mxu0 %vm315_vm1, %v299_v9 }
 0x107   : > { %v385_v11 = vpop.f32.mrf.mxu0 }
 0x108   : > { %v386_v12 = vadd.f32 %v716_v10, %v385_v11 }
 0x109   : > { %v754_v13 = vpop.f32.mrf.mxu0 }
 0x10a   : > { %v389_v14 = vmax.f32 %v386_v12, 0.0 }
 0x10c   : > { %391 = vst.msk [vmem:[#allocation2] sm:$0xff] %vm390_vm2, %v389_v14 }
 0x10d PF: > { %v406_v15 = vld [vmem:[%s1057_s25 + $0x68] sm:$0xff]  ;;  %v408_v16 = vld [vmem:[%s1057_s25 + $0x78] sm:$0xff]  ;;  %v405_v17 = vld [vmem:[%s1057_s25 + $0x60] sm:$0xff]  ;;  %vm431_vm3 = vcmask 261120   ;;  %v939_v32 = vmov 0.0   ;;  %v411_v33 = vlaneseq  ;;  %s726_s30 = sshll.u32 %s923_s21, 9 }
 0x10e   : > { %459 = vmatprep.subr.mxu0 %v406_v15  ;;  %530 = vmatprep.subr.mxu1 %v408_v16  ;;  %v407_v18 = vld [vmem:[%s1057_s25 + $0x70] sm:$0xff]  ;;  %v402_v19 = vld [vmem:[%s1057_s25 + $0x48] sm:$0xff]  ;;  %v404_v20 = vld [vmem:[%s1057_s25 + $0x58] sm:$0xff]  ;;  %s598_s28 = sshll.u32 %s1071_s29, 4  ;;  %s1132_s9 = scalar_lea.hbm %s1181_s5, %s726_s30  ;;  %s599_s28 = int_to_ptr.vmem [resolvable:$true] %s598_s28 }
 0x10f   : > { %460 = vmatpush1.msra.mxu0 %v405_v17  ;;  %531 = vmatpush1.msra.mxu1 %v407_v18  ;;  %v401_v21 = vld [vmem:[%s1057_s25 + $0x40] sm:$0xff]  ;;  %v403_v22 = vld [vmem:[%s1057_s25 + $0x50] sm:$0xff]  ;;  %v398_v23 = vld [vmem:[%s1057_s25 + $0x28] sm:$0xff]  ;;  %v412_v34 = vshrl.u32 %v411_v33, 7  ;;  %s582_s10 = scalar_lea.sflag [#allocation5], %s1053_s12  ;;  %s851_s21 = scalar_lea.vmem %s599_s28, 512 }
 0x110   : > { %461 = vmatprep.subr.mxu0 %v402_v19  ;;  %532 = vmatprep.subr.mxu1 %v404_v20  ;;  %v400_v24 = vld [vmem:[%s1057_s25 + $0x38] sm:$0xff]  ;;  %v397_v25 = vld [vmem:[%s1057_s25 + $0x20] sm:$0xff]  ;;  %v399_v26 = vld [vmem:[%s1057_s25 + $0x30] sm:$0xff]  ;;  %p852_p8 = scmp.ne.s32.totalorder %s599_s28, %s851_s21  ;;  %s940_s13 = smov [#allocation6]  }
 0x111   : > { %462 = vmatpush1.msra.mxu0 %v401_v21  ;;  %533 = vmatpush1.msra.mxu1 %v403_v22  ;;  %v394_v27 = vld [vmem:[%s1057_s25 + $0x8] sm:$0xff]  ;;  %v396_v28 = vld [vmem:[%s1057_s25 + $0x18] sm:$0xff]  ;;  %v393_v29 = vld [vmem:[%s1057_s25] sm:$0xff]  ;;  %v413_v35 = vsub.s32 0, %v412_v34  ;;  %v421_v36 = vsub.s32 2, %v412_v34  ;;  %v417_v38 = vsub.s32 1, %v412_v34 }
 0x112   : > { %463 = vmatprep.subr.mxu0 %v398_v23  ;;  %534 = vmatprep.subr.mxu1 %v400_v24  ;;  %v395_v30 = vld [vmem:[%s1057_s25 + $0x10] sm:$0xff]  ;;  %v409_v37 = vld [vmem:[%s292_s27] sm:$0xf]  ;;  %v425_v39 = vsub.s32 3, %v412_v34  ;;  %p853_p2 = pnand %p852_p8, %p1022_p9  ;;  %s855_s15 = sshll.u32 %s940_s13, 4  ;;  %s856_s15 = int_to_ptr.vmem [resolvable:$false] %s855_s15 }
 0x113   : > { %464 = vmatpush1.msra.mxu0 %v397_v25  ;;  %535 = vmatpush1.msra.mxu1 %v399_v26  ;;  %v392_v31 = vld [vmem:[#allocation2] sm:$0xff]  ;;  %v414_v40 = vrot.slane %v409_v37, %v413_v35  ;;  %v422_v41 = vrot.slane %v409_v37, %v421_v36  ;;  %v418_v42 = vrot.slane %v409_v37, %v417_v38  ;;  %s857_s14 = scalar_lea.vmem %s856_s15, 1024  ;;  %p858_p5 = scmp.lt.s32.totalorder %s599_s28, %s856_s15 }
 0x114   : > { %465 = vmatprep.subr.mxu0 %v394_v27  ;;  %536 = vmatprep.subr.mxu1 %v396_v28  ;;  %v426_v43 = vrot.slane %v409_v37, %v425_v39  ;;  %p854_p3 = pneg %p853_p2  ;;  %p859_p6 = scmp.lt.s32.totalorder %s857_s14, %s851_s21 }
 0x115   : > { %466 = vmatpush1.msra.mxu0 %v393_v29  ;;  %499 = vmatprep.mubr.f32.mxu0 %v939_v32 }
 0x116   : > { %537 = vmatpush1.msra.mxu1 %v395_v30  ;;  %570 = vmatprep.mubr.f32.mxu1 %v939_v32  ;;  %p860_p7 = por %p859_p6, %p858_p5 }
 0x117   : > { %718 = vmatmul.mubr.msk.f32.vlgmr.msra.gmra.mxu0 %vm431_vm3, %v392_v31  ;;  %719 = vmatmul.mubr.msk.f32.vlgmr.msra.gmra.mxu1 %vm431_vm3, %v392_v31 }
 0x118   : > { %p861_p10 = pnand %p860_p7, %p854_p3 }
 0x1d7   : > { %v501_v44 = vpop.f32.mrf.mxu0  ;;  %v572_v45 = vpop.f32.mrf.mxu1 }
 0x1d8   : > { %v502_v46 = vadd.f32 %v501_v44, %v414_v40  ;;  %v573_v47 = vadd.f32 %v572_v45, %v422_v41 }
 0x1d9   : > { %v503_v48 = vpop.f32.mrf.mxu0  ;;  %v574_v49 = vpop.f32.mrf.mxu1 }
 0x1da   : > { %577 = vst [vmem:[%s1071_s29] sm:$0xff] %v502_v46  ;;  %579 = vst [vmem:[%s1071_s29 + $0x10] sm:$0xff] %v573_v47  ;;  %v504_v50 = vadd.f32 %v503_v48, %v418_v42  ;;  %v575_v51 = vadd.f32 %v574_v49, %v426_v43 }
 0x1dc   : > { %578 = vst [vmem:[%s1071_s29 + $0x8] sm:$0xff] %v504_v50  ;;  %580 = vst [vmem:[%s1071_s29 + $0x18] sm:$0xff] %v575_v51 }
 0x1dd   : > { %864 = shalt.err (!%p861_p10)
}
 0x1de   : > { %s865_s29 = scalar_lea.hbm %s1132_s9, 512  ;;  %s869_s24 = scalar_lea.hbm %s1181_s5, 1024 }
 0x1df   : > { %p866_p4 = scmp.ne.s32.totalorder %s1132_s9, %s865_s29  ;;  %p870_p12 = scmp.lt.s32.totalorder %s1132_s9, %s1181_s5 }
 0x1e0   : > { %p871_p0 = scmp.lt.s32.totalorder %s869_s24, %s865_s29 }
 0x1e1   : > { %p867_p13 = pnand %p866_p4, %p1022_p9 }
 0x1e2   : > { %p872_p8 = por %p871_p0, %p870_p12 }
 0x1e3   : > { %p868_p1 = pneg %p867_p13 }
 0x1e5   : > { %p873_p2 = pnand %p872_p8, %p868_p1 }
 0x1e7   : > { %876 = shalt.err (!%p873_p2)
}
 0x1e8   : > { %757 = dma.vmem_to_hbm [thread:$0]  (%p1022_p9), %s599_s28, 512, %s1132_s9, %s582_s10  }
 0x1e9 PF: > { %s610_s30 = sand.u32 1, %s911_s18   ;;  %p1187_p3 = scmp.ge.s32.totalorder %s931_s23, 2 }
 0x1ea   : > { %s611_s16 = scalar_lea.sflag [#allocation5], %s610_s30 }
 0x1eb   : > { %p764_p5 = pnand %p1187_p3, %p1029_p11 }
 0x1ed   : > { %p765_p6 = pneg %p764_p5 }
 0x1ef   : > { %906 = dma.done.wait (%p765_p6), %s611_s16, 512  }
 0x1f0   : > { %908 = vsyncadd (%p765_p6), %s611_s16, 4294966784  ;;  %s21_s23 = sadd.s32 1, %s931_s23   ;;  %s1188_s18 = smov %s915_s19 }
 0x1f1   : > { %p18_p7 = scmp.ge.s32.totalorder %s21_s23, 4   ;;  %s1189_s19 = smov %s919_s20 }
 0x1f2   : > { %s1190_s20 = smov %s1027_s7  ;;  %s1191_s21 = smov %s927_s22 }
 0x1f3   : > { %s1192_s22 = smov %s1194_s26  ;;  %20 = sbr.rel (!%p18_p7) target bundleno = 6 (0x6), region = 95 }
 0x1f8   :  { %616 = vsyncpa [#allocation4], 1 }
 0x1f9   :  { %618 = vsyncpa [#allocation4 + $0x1], 1 }
 0x1fa   :  { %619 = vsyncpa [#allocation5], 1 }
 0x1fb   :  { %621 = vsyncpa [#allocation5 + $0x1], 1 }

</bundles_post_ra>
